<compile_context>
chip_gen: v6e
topology: v6e:2x2x1
jax: 0.10.0
libtpu: 0.0.40
codegen_flags: <defaults>
</compile_context>

<pallas_src>
import functools

import jax
import jax.numpy as jnp
from jax import lax
from jax.experimental import pallas as pl
from jax.experimental.pallas import tpu as pltpu


# Explicit scoped-VMEM budget: large enough for tm=512 x tn=512 lm_head tiles with
# double buffering, with headroom on v7x's 64 MiB physical VMEM (128 MiB on v5e/v6e).
_VMEM_LIMIT_BYTES = 48 * 1024 * 1024
_TM_TARGET = 512    # row tile for lm_head (multiple of 16: bf16 sublane packing)
_TN_TARGET = 512    # vocab tile for lm_head (multiple of 128 lanes)


def _cdiv(a, b):
    return -(-a // b)


def _round_up(a, b):
    return _cdiv(a, b) * b


def _round_down(a, b):
    return (a // b) * b


def _row_tiling(M, tm_target=_TM_TARGET, *, align=16, min_row_tiles=1):
    """Pick (padded_M, tm): tm is a multiple of `align`, padded_M a multiple of tm."""
    Mp0 = _round_up(max(M, 1), align)
    n_tiles = _cdiv(Mp0, tm_target)
    if Mp0 >= min_row_tiles * align:
        # v7x megacore: keep the 'parallel' row grid axis >= min_row_tiles.
        n_tiles = max(n_tiles, min_row_tiles)
    tm = max(align, _round_up(_cdiv(Mp0, n_tiles), align))
    Mp = tm * _cdiv(Mp0, tm)
    return Mp, tm


def _col_tiling(V, tn_target=_TN_TARGET, *, align=128):
    """Pick (padded_V, tn): tn is a multiple of 128, padded_V a multiple of tn."""
    Vp0 = _round_up(V, align)
    tn = max(align, min(_round_down(tn_target, align), Vp0))
    Vp = tn * _cdiv(Vp0, tn)
    return Vp, tn


def _pad2d(x, rows, cols, value=0):
    r, c = x.shape
    if rows == r and cols == c:
        return x
    return jnp.pad(x, ((0, rows - r), (0, cols - c)), constant_values=value)


# ---------------------------------------------------------------------------
# Kernel 1: LatentReasoningLayer
#   current = hidden_states[:, -1, :]
#   repeat T times: current = relu(current @ W_t + b); emit current
#   Output written directly as [Bp, T, H]; loop statically unrolled (T is tiny).
# ---------------------------------------------------------------------------
def _latent_kernel(last_ref, w_ref, b_ref, out_ref):
    w = w_ref[...]                      # [H, H] bf16 (in->out layout), hoisted
    b = b_ref[...]                      # [1, H] f32, hoisted
    cur = last_ref[...]                 # [Bp, H] f32
    num_tokens = out_ref.shape[1]
    for t in range(num_tokens):         # static unroll: T is a compile-time constant
        nxt = jnp.dot(cur.astype(jnp.bfloat16), w,
                      preferred_element_type=jnp.float32) + b
        cur = jnp.maximum(nxt, 0.0)     # ReLU
        out_ref[:, t, :] = cur
    # TODO(synk): for very large H (>=8192) tile the [H, H] weight over K with
    # emit_pipeline, and prefetch it while the lm_head on the S original positions runs.


def latent_tokens_pallas(last_state, w_bf16, b, num_latent_tokens):
    B, H = last_state.shape
    Bp = max(8, _round_up(B, 8))        # sublane-pad the batch dimension
    if Bp != B:
        last_state = jnp.pad(last_state, ((0, Bp - B), (0, 0)))
    out = pl.pallas_call(
        _latent_kernel,
        out_shape=jax.ShapeDtypeStruct((Bp, num_latent_tokens, H), jnp.float32),
        in_specs=[
            pl.BlockSpec(memory_space=pltpu.MemorySpace.VMEM),
            pl.BlockSpec(memory_space=pltpu.MemorySpace.VMEM),
            pl.BlockSpec(memory_space=pltpu.MemorySpace.VMEM),
        ],
        out_specs=pl.BlockSpec(memory_space=pltpu.MemorySpace.VMEM),
        compiler_params=pltpu.CompilerParams(
            vmem_limit_bytes=_VMEM_LIMIT_BYTES,
        ),
    )(last_state, w_bf16, b)
    return out[:B]                      # [B, T, H] — final layout, no transpose needed


# ---------------------------------------------------------------------------
# Kernel 2: plain lm_head  logits = x @ W_t   (Qwen lm_head has no bias)
#   2-D grid over (row tiles, vocab tiles); bf16 operands, f32 accumulation.
#   Rows and vocab are zero-padded in the wrapper; padding is sliced away afterwards.
# ---------------------------------------------------------------------------
def _lm_head_kernel(x_ref, w_ref, o_ref):
    o_ref[...] = jnp.dot(x_ref[...], w_ref[...],
                         preferred_element_type=jnp.float32).astype(o_ref.dtype)


def lm_head_pallas(x, w_bf16, *, tm_target=_TM_TARGET, tn_target=_TN_TARGET,
                   out_dtype=jnp.float32):
    M, H = x.shape
    Hw, V = w_bf16.shape
    assert H == Hw
    Mp, tm = _row_tiling(M, tm_target)
    Vp, tn = _col_tiling(V, tn_target)
    xp = _pad2d(x.astype(jnp.bfloat16), Mp, H)
    wp = _pad2d(w_bf16, H, Vp)   # NOTE: pre-pad once at weight-load time in real use
    # NOTE: if tn ever collapses below 512 (tiny vocab), pipeline_mode=pl.Buffered(3)
    # on the weight spec would hide the exposed weight DMA; unnecessary with padding.
    out = pl.pallas_call(
        _lm_head_kernel,
        out_shape=jax.ShapeDtypeStruct((Mp, Vp), out_dtype),
        grid=(Mp // tm, Vp // tn),
        in_specs=[
            pl.BlockSpec((tm, H), lambda i, j: (i, 0)),
            pl.BlockSpec((H, tn), lambda i, j: (0, j)),
        ],
        out_specs=pl.BlockSpec((tm, tn), lambda i, j: (i, j)),
        compiler_params=pltpu.CompilerParams(
            dimension_semantics=("parallel", "parallel"),
            vmem_limit_bytes=_VMEM_LIMIT_BYTES,
        ),
    )(xp, wp)
    return out[:M, :V]


# ---------------------------------------------------------------------------
# Kernel 3: fused lm_head + cross-entropy statistics (training path).
#   While streaming W[:, j*tn:(j+1)*tn] vocab tiles, maintain per-row running max (m),
#   scaled sum-exp (l) and the picked label logit (p) as resident VMEM accumulator
#   outputs — the logits never get re-read from HBM. Labels use ignore_index = -100.
#   Padded vocab columns (V..Vp) are masked to -inf before the max/exp and can never
#   match a label. Full-logits writeback is optional and bf16 by default.
# ---------------------------------------------------------------------------
def _ce_step(x_ref, w_ref, lab_ref, m_ref, l_ref, p_ref, *, v_valid, tn, needs_mask):
    j = pl.program_id(1)

    @pl.when(j == 0)
    def _():
        m_ref[...] = jnp.full(m_ref.shape, -jnp.inf, dtype=jnp.float32)
        l_ref[...] = jnp.zeros(l_ref.shape, dtype=jnp.float32)
        p_ref[...] = jnp.zeros(p_ref.shape, dtype=jnp.float32)

    logits = jnp.dot(x_ref[...], w_ref[...],
                     preferred_element_type=jnp.float32)        # [tm, tn] f32

    col = lax.broadcasted_iota(jnp.int32, logits.shape, 1)      # local column index
    if needs_mask:
        # Only the final vocab tile has padded columns; elsewhere the threshold
        # exceeds tn so the select is a no-op (VALU filler hidden under the MXU).
        logits = jnp.where(col < (v_valid - j * tn), logits, -jnp.inf)

    # Online log-sum-exp accumulation over the vocab tiles.
    tile_max = jnp.max(logits, axis=-1, keepdims=True)          # [tm, 1]
    m_new = jnp.maximum(m_ref[...], tile_max)
    alpha = jnp.exp(m_ref[...] - m_new)
    l_ref[...] = alpha * l_ref[...] + jnp.sum(jnp.exp(logits - m_new),
                                              axis=-1, keepdims=True)
    m_ref[...] = m_new

    # Picked logit: local iota vs. (label - j*tn). ignore_index=-100 (and padded
    # rows / padded columns) never match because the shifted label is out of range.
    lab_local = lab_ref[...] - j * tn                            # [tm, 1] int32
    p_ref[...] += jnp.sum(jnp.where(col == lab_local, logits, 0.0),
                          axis=-1, keepdims=True)
    return logits


def _lm_head_ce_kernel(x_ref, w_ref, lab_ref, logits_ref, m_ref, l_ref, p_ref,
                       *, v_valid, tn, needs_mask):
    logits = _ce_step(x_ref, w_ref, lab_ref, m_ref, l_ref, p_ref,
                      v_valid=v_valid, tn=tn, needs_mask=needs_mask)
    logits_ref[...] = logits.astype(logits_ref.dtype)


def _lm_head_ce_stats_kernel(x_ref, w_ref, lab_ref, m_ref, l_ref, p_ref,
                             *, v_valid, tn, needs_mask):
    _ce_step(x_ref, w_ref, lab_ref, m_ref, l_ref, p_ref,
             v_valid=v_valid, tn=tn, needs_mask=needs_mask)


def lm_head_ce_pallas(x, w_bf16, labels_flat, *,
                      tm_target=_TM_TARGET, tn_target=_TN_TARGET,
                      return_logits=True, logits_dtype=jnp.bfloat16):
    M, H = x.shape
    _, V = w_bf16.shape
    # >=2 row tiles when possible so the 'parallel' row axis feeds both v7x cores
    # (the vocab axis is 'arbitrary' and cannot be sharded across TensorCores).
    Mp, tm = _row_tiling(M, tm_target, min_row_tiles=2)
    Vp, tn = _col_tiling(V, tn_target)
    needs_mask = Vp != V

    xp = _pad2d(x.astype(jnp.bfloat16), Mp, H)
    wp = _pad2d(w_bf16, H, Vp)   # NOTE: pre-pad once at weight-load time in real use
    labp = jnp.pad(labels_flat.astype(jnp.int32), (0, Mp - M),
                   constant_values=-100).reshape(Mp, 1)

    acc_shape = jax.ShapeDtypeStruct((Mp, 1), jnp.float32)
    acc_spec = pl.BlockSpec((tm, 1), lambda i, j: (i, 0))       # resident accumulators
    in_specs = [
        pl.BlockSpec((tm, H), lambda i, j: (i, 0)),
        pl.BlockSpec((H, tn), lambda i, j: (0, j)),
        pl.BlockSpec((tm, 1), lambda i, j: (i, 0)),
    ]
    cparams = pltpu.CompilerParams(
        dimension_semantics=("parallel", "arbitrary"),          # vocab (reduction) last
        vmem_limit_bytes=_VMEM_LIMIT_BYTES,
    )
    grid = (Mp // tm, Vp // tn)

    if return_logits:
        kern = functools.partial(_lm_head_ce_kernel,
                                 v_valid=V, tn=tn, needs_mask=needs_mask)
        logits, m, l, picked = pl.pallas_call(
            kern,
            out_shape=(
                jax.ShapeDtypeStruct((Mp, Vp), logits_dtype),   # logits (bf16 default)
                acc_shape, acc_shape, acc_shape,                # max / sum-exp / picked
            ),
            grid=grid,
            in_specs=in_specs,
            out_specs=(pl.BlockSpec((tm, tn), lambda i, j: (i, j)),
                       acc_spec, acc_spec, acc_spec),
            compiler_params=cparams,
        )(xp, wp, labp)
        logits = logits[:M, :V]
    else:
        kern = functools.partial(_lm_head_ce_stats_kernel,
                                 v_valid=V, tn=tn, needs_mask=needs_mask)
        m, l, picked = pl.pallas_call(
            kern,
            out_shape=(acc_shape, acc_shape, acc_shape),
            grid=grid,
            in_specs=in_specs,
            out_specs=(acc_spec, acc_spec, acc_spec),
            compiler_params=cparams,
        )(xp, wp, labp)
        logits = None
    return logits, m[:M], l[:M], picked[:M]


# ---------------------------------------------------------------------------
# CoconutQwen forward (the part after the base transformer).
# ---------------------------------------------------------------------------
def coconut_forward(hidden_states, params, labels=None, *,
                    return_logits=True, logits_dtype=jnp.bfloat16):
    """hidden_states: [B, S, H] float32 (== outputs.hidden_states[-1])."""
    B, S, H = hidden_states.shape
    T = params["num_latent_tokens"]

    if labels is not None:
        # Training path. The PyTorch module truncates logits to [:, :S, :] when labels
        # are provided, so the latent-token projections never influence the outputs:
        # skip them entirely (no concat, no wasted lm_head FLOPs / HBM writes).
        x = hidden_states.reshape(B * S, H)
        ignore = jnp.full((B, 1), -100, dtype=jnp.int32)
        shift_labels = jnp.concatenate(
            [labels.astype(jnp.int32)[:, 1:], ignore], axis=1).reshape(B * S)

        logits_flat, m, l, picked = lm_head_ce_pallas(
            x, params["lm_head_w_t"], shift_labels,
            return_logits=return_logits, logits_dtype=logits_dtype)

        lse = m + jnp.log(l)                                   # [M, 1]
        per_row = (lse - picked)[:, 0]                         # [M]
        valid = shift_labels >= 0                              # ignore_index = -100
        per_row = jnp.where(valid, per_row, 0.0)
        denom = jnp.maximum(jnp.sum(valid.astype(jnp.float32)), 1.0)
        loss = jnp.sum(per_row) / denom

        logits = None
        if return_logits:
            V = logits_flat.shape[-1]
            logits = logits_flat.reshape(B, S, V)
        return {"loss": loss, "logits": logits}

    # Inference path: logits for original + latent positions.
    latent = latent_tokens_pallas(
        hidden_states[:, -1, :], params["latent_w_t"], params["latent_b"], T)
    # Small [B, S+T, H] concat (~H/V of the logits writeback; negligible).
    ext = jnp.concatenate([hidden_states, latent], axis=1)
    logits = lm_head_pallas(ext.reshape(B * (S + T), H), params["lm_head_w_t"],
                            out_dtype=logits_dtype)
    logits = logits.reshape(B, S + T, -1)
    return {"loss": None, "logits": logits}


# ---------------------------------------------------------------------------
if __name__ == "__main__":
    # Small, TPU-friendly shapes; S/V chosen so both row and vocab padding paths run
    # (B*S = 18, B*(S+T) = 22 not multiples of 16; V = 1000 not a multiple of 128).
    B, S, H, V, T = 2, 9, 128, 1000, 2

    key = jax.random.PRNGKey(0)
    k_hid, k_w1, k_b1, k_w2, k_lab = jax.random.split(key, 5)

    # Synthetic "hidden_states[-1]" from the (untranslatable) base model.
    hidden_states = jax.random.normal(k_hid, (B, S, H), dtype=jnp.float32)

    params = {
        "num_latent_tokens": T,
        # nn.Linear(H, H): weight [H, H] -> stored transposed [in, out], bf16
        "latent_w_t": (jax.random.normal(k_w1, (H, H), dtype=jnp.float32)
                       * 0.05).astype(jnp.bfloat16),
        "latent_b": jax.random.normal(k_b1, (1, H), dtype=jnp.float32) * 0.01,
        # lm_head: nn.Linear(H, V, bias=False): weight [V, H] -> transposed [H, V], bf16
        "lm_head_w_t": (jax.random.normal(k_w2, (H, V), dtype=jnp.float32)
                        * 0.05).astype(jnp.bfloat16),
    }

    labels = jax.random.randint(k_lab, (B, S), 0, V, dtype=jnp.int32)

    # ---- training path (labels given) ----
    out_train = coconut_forward(hidden_states, params, labels=labels)
    jax.block_until_ready(out_train["logits"])
    jax.block_until_ready(out_train["loss"])
    assert out_train["logits"].shape == (B, S, V)
    assert out_train["loss"].shape == ()
    assert bool(jnp.isfinite(out_train["loss"]))

    # Pure-JAX reference (same bf16 rounding of operands, f32 accumulation).
    w_lm_f32 = params["lm_head_w_t"].astype(jnp.float32)
    x32 = hidden_states.reshape(B * S, H).astype(jnp.bfloat16).astype(jnp.float32)
    ref_logits_train = (x32 @ w_lm_f32).reshape(B, S, V)
    assert bool(jnp.allclose(out_train["logits"].astype(jnp.float32),
                             ref_logits_train, rtol=5e-2, atol=5e-2))

    ref_shift_logits = ref_logits_train[:, :-1, :].reshape(-1, V)
    ref_shift_labels = labels[:, 1:].reshape(-1)
    ref_lse = jax.nn.logsumexp(ref_shift_logits, axis=-1)
    ref_picked = jnp.take_along_axis(
        ref_shift_logits, ref_shift_labels[:, None], axis=-1)[:, 0]
    ref_loss = jnp.mean(ref_lse - ref_picked)
    assert bool(jnp.allclose(out_train["loss"], ref_loss, rtol=1e-2, atol=1e-2))

    # ---- training path, loss-only (skips the full-logits HBM writeback) ----
    out_loss_only = coconut_forward(hidden_states, params, labels=labels,
                                    return_logits=False)
    jax.block_until_ready(out_loss_only["loss"])
    assert out_loss_only["logits"] is None
    assert bool(jnp.allclose(out_loss_only["loss"], out_train["loss"],
                             rtol=1e-5, atol=1e-5))

    # ---- inference path (no labels) ----
    out_gen = coconut_forward(hidden_states, params, labels=None)
    jax.block_until_ready(out_gen["logits"])
    assert out_gen["logits"].shape == (B, S + T, V)
    assert out_gen["loss"] is None

    w_lat_f32 = params["latent_w_t"].astype(jnp.float32)
    cur = hidden_states[:, -1, :]
    lat_ref = []
    for _ in range(T):
        cur = jnp.maximum(
            cur.astype(jnp.bfloat16).astype(jnp.float32) @ w_lat_f32
            + params["latent_b"], 0.0)
        lat_ref.append(cur[:, None, :])
    ref_ext = jnp.concatenate([hidden_states, jnp.concatenate(lat_ref, axis=1)], axis=1)
    ref_logits_full = (ref_ext.reshape(-1, H).astype(jnp.bfloat16).astype(jnp.float32)
                       @ w_lm_f32).reshape(B, S + T, V)
    assert bool(jnp.allclose(out_gen["logits"].astype(jnp.float32),
                             ref_logits_full, rtol=5e-2, atol=5e-2))

    print("KERNEL_OK")
</pallas_src>

<mosaic_0001>
module attributes {stable_mosaic.version = 11 : i64} {
  func.func @_lm_head_ce_kernel(%arg0: i32, %arg1: i32, %arg2: memref<16x128xbf16, #tpu.memory_space<vmem>>, %arg3: memref<128x512xbf16, #tpu.memory_space<vmem>>, %arg4: memref<16x1xi32, #tpu.memory_space<vmem>>, %arg5: memref<16x512xbf16, #tpu.memory_space<vmem>>, %arg6: memref<16x1xf32, #tpu.memory_space<vmem>>, %arg7: memref<16x1xf32, #tpu.memory_space<vmem>>, %arg8: memref<16x1xf32, #tpu.memory_space<vmem>>) attributes {dimension_semantics = [#tpu.dimension_semantics<parallel>, #tpu.dimension_semantics<arbitrary>], iteration_bounds = array<i64: 2, 2>, scalar_prefetch = 0 : i64, scratch_operands = 0 : i64, tpu.core_type = #tpu.core_type<tc>, window_params = [{transform_indices = @transform_0, window_bounds = array<i64: 16, 128>}, {transform_indices = @transform_1, window_bounds = array<i64: 128, 512>}, {transform_indices = @transform_2, window_bounds = array<i64: 16, 1>}, {transform_indices = @transform_3, window_bounds = array<i64: 16, 512>}, {transform_indices = @transform_4, window_bounds = array<i64: 16, 1>}, {transform_indices = @transform_5, window_bounds = array<i64: 16, 1>}, {transform_indices = @transform_6, window_bounds = array<i64: 16, 1>}]} {
    %c0_i32 = arith.constant 0 : i32
    %0 = arith.cmpi eq, %arg1, %c0_i32 : i32
    %1 = arith.extui %0 : i1 to i32
    %c0_i32_0 = arith.constant 0 : i32
    %2 = arith.cmpi ne, %1, %c0_i32_0 : i32
    scf.if %2 {
      %cst_28 = arith.constant 0xFF800000 : f32
      %45 = vector.broadcast %cst_28 : f32 to vector<16x1xf32>
      %c0_29 = arith.constant 0 : index
      %c0_30 = arith.constant 0 : index
      %46 = vector.load %arg6[%c0_29, %c0_30] : memref<16x1xf32, #tpu.memory_space<vmem>>, vector<16x1xf32>
      tpu.vector_store %arg6[%c0_29, %c0_30], %45 {strides = array<i32>} : memref<16x1xf32, #tpu.memory_space<vmem>>, vector<16x1xf32>,
      %cst_31 = arith.constant 0.000000e+00 : f32
      %47 = vector.broadcast %cst_31 : f32 to vector<16x1xf32>
      %c0_32 = arith.constant 0 : index
      %c0_33 = arith.constant 0 : index
      %48 = vector.load %arg7[%c0_32, %c0_33] : memref<16x1xf32, #tpu.memory_space<vmem>>, vector<16x1xf32>
      tpu.vector_store %arg7[%c0_32, %c0_33], %47 {strides = array<i32>} : memref<16x1xf32, #tpu.memory_space<vmem>>, vector<16x1xf32>,
      %cst_34 = arith.constant 0.000000e+00 : f32
      %49 = vector.broadcast %cst_34 : f32 to vector<16x1xf32>
      %c0_35 = arith.constant 0 : index
      %c0_36 = arith.constant 0 : index
      %50 = vector.load %arg8[%c0_35, %c0_36] : memref<16x1xf32, #tpu.memory_space<vmem>>, vector<16x1xf32>
      tpu.vector_store %arg8[%c0_35, %c0_36], %49 {strides = array<i32>} : memref<16x1xf32, #tpu.memory_space<vmem>>, vector<16x1xf32>,
    } else {
    }
    %c0 = arith.constant 0 : index
    %c0_1 = arith.constant 0 : index
    %3 = vector.load %arg2[%c0, %c0_1] : memref<16x128xbf16, #tpu.memory_space<vmem>>, vector<16x128xbf16>
    %c0_2 = arith.constant 0 : index
    %c0_3 = arith.constant 0 : index
    %4 = vector.load %arg3[%c0_2, %c0_3] : memref<128x512xbf16, #tpu.memory_space<vmem>>, vector<128x512xbf16>
    %cst = arith.constant dense<0.000000e+00> : vector<16x512xf32>
    %5 = tpu.matmul %3, %4, %cst {dimension_numbers = #tpu.dot_dimension_numbers<[1], [0], [0], [1], [0, 0, 1, 1], [], []>} : vector<16x128xbf16>, vector<128x512xbf16>, vector<16x512xf32> -> vector<16x512xf32>
    %6 = tpu.iota {dimensions = array<i32: 1>} : vector<16x512xi32>
    %c512_i32 = arith.constant 512 : i32
    %7 = arith.muli %arg1, %c512_i32 : i32
    %c1000_i32 = arith.constant 1000 : i32
    %8 = arith.subi %c1000_i32, %7 : i32
    %9 = vector.broadcast %8 : i32 to vector<16x512xi32>
    %10 = arith.cmpi slt, %6, %9 : vector<16x512xi32>
    %cst_4 = arith.constant 0xFF800000 : f32
    %11 = vector.broadcast %cst_4 : f32 to vector<16x512xf32>
    %12 = arith.select %10, %5, %11 : vector<16x512xi1>, vector<16x512xf32>
    %cst_5 = arith.constant dense<0xFF800000> : vector<16xf32>
    %13 = vector.multi_reduction <maximumf>, %12, %cst_5 [1] : vector<16x512xf32> to vector<16xf32>
    %14 = vector.shape_cast %13 : vector<16xf32> to vector<16x1xf32>
    %c0_6 = arith.constant 0 : index
    %c0_7 = arith.constant 0 : index
    %15 = vector.load %arg6[%c0_6, %c0_7] : memref<16x1xf32, #tpu.memory_space<vmem>>, vector<16x1xf32>
    %16 = arith.maximumf %15, %14 : vector<16x1xf32>
    %c0_8 = arith.constant 0 : index
    %c0_9 = arith.constant 0 : index
    %17 = vector.load %arg6[%c0_8, %c0_9] : memref<16x1xf32, #tpu.memory_space<vmem>>, vector<16x1xf32>
    %18 = arith.subf %17, %16 : vector<16x1xf32>
    %19 = math.exp %18 : vector<16x1xf32>
    %c0_10 = arith.constant 0 : index
    %c0_11 = arith.constant 0 : index
    %20 = vector.load %arg7[%c0_10, %c0_11] : memref<16x1xf32, #tpu.memory_space<vmem>>, vector<16x1xf32>
    %21 = arith.mulf %19, %20 : vector<16x1xf32>
    %22 = vector.broadcast %16 : vector<16x1xf32> to vector<16x512xf32>
    %23 = arith.subf %12, %22 : vector<16x512xf32>
    %24 = math.exp %23 : vector<16x512xf32>
    %cst_12 = arith.constant dense<0.000000e+00> : vector<16xf32>
    %25 = vector.multi_reduction <add>, %24, %cst_12 [1] : vector<16x512xf32> to vector<16xf32>
    %26 = vector.shape_cast %25 : vector<16xf32> to vector<16x1xf32>
    %27 = arith.addf %21, %26 : vector<16x1xf32>
    %c0_13 = arith.constant 0 : index
    %c0_14 = arith.constant 0 : index
    %28 = vector.load %arg7[%c0_13, %c0_14] : memref<16x1xf32, #tpu.memory_space<vmem>>, vector<16x1xf32>
    tpu.vector_store %arg7[%c0_13, %c0_14], %27 {strides = array<i32>} : memref<16x1xf32, #tpu.memory_space<vmem>>, vector<16x1xf32>,
    %c0_15 = arith.constant 0 : index
    %c0_16 = arith.constant 0 : index
    %29 = vector.load %arg6[%c0_15, %c0_16] : memref<16x1xf32, #tpu.memory_space<vmem>>, vector<16x1xf32>
    tpu.vector_store %arg6[%c0_15, %c0_16], %16 {strides = array<i32>} : memref<16x1xf32, #tpu.memory_space<vmem>>, vector<16x1xf32>,
    %c0_17 = arith.constant 0 : index
    %c0_18 = arith.constant 0 : index
    %30 = vector.load %arg4[%c0_17, %c0_18] : memref<16x1xi32, #tpu.memory_space<vmem>>, vector<16x1xi32>
    %c512_i32_19 = arith.constant 512 : i32
    %31 = arith.muli %arg1, %c512_i32_19 : i32
    %32 = vector.broadcast %31 : i32 to vector<16x1xi32>
    %33 = arith.subi %30, %32 : vector<16x1xi32>
    %c0_20 = arith.constant 0 : index
    %c0_21 = arith.constant 0 : index
    %34 = vector.load %arg8[%c0_20, %c0_21] : memref<16x1xf32, #tpu.memory_space<vmem>>, vector<16x1xf32>
    %35 = vector.broadcast %33 : vector<16x1xi32> to vector<16x512xi32>
    %36 = arith.cmpi eq, %6, %35 : vector<16x512xi32>
    %cst_22 = arith.constant 0.000000e+00 : f32
    %37 = vector.broadcast %cst_22 : f32 to vector<16x512xf32>
    %38 = arith.select %36, %12, %37 : vector<16x512xi1>, vector<16x512xf32>
    %cst_23 = arith.constant dense<0.000000e+00> : vector<16xf32>
    %39 = vector.multi_reduction <add>, %38, %cst_23 [1] : vector<16x512xf32> to vector<16xf32>
    %40 = vector.shape_cast %39 : vector<16xf32> to vector<16x1xf32>
    %41 = arith.addf %34, %40 : vector<16x1xf32>
    %c0_24 = arith.constant 0 : index
    %c0_25 = arith.constant 0 : index
    %42 = vector.load %arg8[%c0_24, %c0_25] : memref<16x1xf32, #tpu.memory_space<vmem>>, vector<16x1xf32>
    tpu.vector_store %arg8[%c0_24, %c0_25], %41 {strides = array<i32>} : memref<16x1xf32, #tpu.memory_space<vmem>>, vector<16x1xf32>,
    %43 = arith.truncf %12 : vector<16x512xf32> to vector<16x512xbf16>
    %c0_26 = arith.constant 0 : index
    %c0_27 = arith.constant 0 : index
    %44 = vector.load %arg5[%c0_26, %c0_27] : memref<16x512xbf16, #tpu.memory_space<vmem>>, vector<16x512xbf16>
    tpu.vector_store %arg5[%c0_26, %c0_27], %43 {strides = array<i32>} : memref<16x512xbf16, #tpu.memory_space<vmem>>, vector<16x512xbf16>,
    return
  }
  func.func @transform_0(%arg0: i32, %arg1: i32) -> (i32, i32) {
    %c0_i32 = arith.constant 0 : i32
    %c0_i32_0 = arith.constant 0 : i32
    return %arg0, %c0_i32 : i32, i32
  }
  func.func @transform_1(%arg0: i32, %arg1: i32) -> (i32, i32) {
    %c0_i32 = arith.constant 0 : i32
    %c0_i32_0 = arith.constant 0 : i32
    return %c0_i32, %arg1 : i32, i32
  }
  func.func @transform_2(%arg0: i32, %arg1: i32) -> (i32, i32) {
    %c0_i32 = arith.constant 0 : i32
    %c0_i32_0 = arith.constant 0 : i32
    return %arg0, %c0_i32 : i32, i32
  }
  func.func @transform_3(%arg0: i32, %arg1: i32) -> (i32, i32) {
    %c0_i32 = arith.constant 0 : i32
    return %arg0, %arg1 : i32, i32
  }
  func.func @transform_4(%arg0: i32, %arg1: i32) -> (i32, i32) {
    %c0_i32 = arith.constant 0 : i32
    %c0_i32_0 = arith.constant 0 : i32
    return %arg0, %c0_i32 : i32, i32
  }
  func.func @transform_5(%arg0: i32, %arg1: i32) -> (i32, i32) {
    %c0_i32 = arith.constant 0 : i32
    %c0_i32_0 = arith.constant 0 : i32
    return %arg0, %c0_i32 : i32, i32
  }
  func.func @transform_6(%arg0: i32, %arg1: i32) -> (i32, i32) {
    %c0_i32 = arith.constant 0 : i32
    %c0_i32_0 = arith.constant 0 : i32
    return %arg0, %c0_i32 : i32, i32
  }
}

</mosaic_0001>

<bundles_post_ra>
// kernel: tpu_custom_call.1
= control target key start
LH: loop header
LB: loop body
LE: loop exit
PB: predicated region body
PF: predicated region fallthrough
CT: control target
= control target key end

     0   :  { %s1921_s0 = inlined_call_operand.vmem [shape: bf16[32,128], index: 0, kind: input, shape index: {}]   ;;  %s1922_s1 = inlined_call_operand.hbm [shape: bf16[128,1024], index: 1, kind: input, shape index: {}]   ;;  %s1923_s2 = inlined_call_operand.vmem [shape: s32[32,1], index: 2, kind: input, shape index: {}]   ;;  %s1924_s3 = inlined_call_operand.hbm [shape: bf16[32,1024], index: 3, kind: output, shape index: {0}]   ;;  %s1925_s4 = inlined_call_operand.vmem [shape: f32[32,1], index: 4, kind: output, shape index: {1}]   ;;  %s1926_s5 = inlined_call_operand.vmem [shape: f32[32,1], index: 5, kind: output, shape index: {2}]   ;;  %s1927_s6 = inlined_call_operand.vmem [shape: f32[32,1], index: 6, kind: output, shape index: {3}]  }
   0x1   :  { %1936 = sst [smem:[#allocation17_spill]] %s1922_s1 }
   0x2   :  { %12 = vsyncpa [#allocation3], 0 }
   0x3   :  { %14 = vsyncpa [#allocation3 + $0x1], 0 }
   0x4   :  { %15 = vsyncpa [#allocation4], 0 }
   0x5   :  { %17 = vsyncpa [#allocation4 + $0x1], 0  ;;  %s1515_s21 = smov 0   ;;  %s1517_s22 = smov 0  }
   0x6   :  { %s1519_s23 = smov 0   ;;  %s1521_s24 = smov 0  }
   0x7   :  { %s1523_s25 = smov 0   ;;  %s1525_s26 = smov 0  }
   0x8   :  { %s1527_s27 = smov 0   ;;  %s1529_s28 = smov 0  }
   0x9   :  { %s1531_s29 = smov 0   ;;  %s1533_s30 = smov 0  }
   0xa   :  { %s1535_s7 = smov 0  }
   0xb LB: > { %1937 = sst [smem:[#allocation8_spill]] %s1435_s23  ;;  %s1065_s8 = sadd.s32 4294967295, %s1467_s7   ;;  %s1467_s7 = sphi %s1535_s7, %s23_s7   ;;  %s1463_s30 = sphi %s1533_s30, %s1961_s30   ;;  %s1459_s29 = sphi %s1531_s29, %s1960_s29   ;;  %s1455_s28 = sphi %s1529_s28, %s1959_s28   ;;  %s1451_s27 = sphi %s1527_s27, %s1958_s27   ;;  %s1447_s26 = sphi %s1525_s26, %s1957_s26   ;;  %s1443_s25 = sphi %s1523_s25, %s1956_s25   ;;  %s1439_s24 = sphi %s1521_s24, %s1955_s24   ;;  %s1435_s23 = sphi %s1519_s23, %s1954_s23   ;;  %s1431_s22 = sphi %s1517_s22, %s1963_s22   ;;  %s1427_s21 = sphi %s1515_s21, %s1962_s21  }
   0xc   : > { %1938 = sst [smem:[#allocation9_spill]] %s1443_s25  ;;  %s1066_s9 = sadd.s32 4294967294, %s1467_s7  }
   0xd   : > { %1939 = sst [smem:[#allocation10_spill]] %s1447_s26  ;;  %s32_s10 = sadd.s32 1, %s1459_s29 }
   0xe   : > { %1940 = sst [smem:[#allocation11_spill]] %s1459_s29  ;;  %s35_s11 = sadd.s32 1, %s1463_s30 }
   0xf   : > { %1941 = sst [smem:[#allocation12_spill]] %s1463_s30  ;;  %p33_p0 = scmp.ge.s32.totalorder %s32_s10, 2 }
  0x10   : > { %s68_s12 = sadd.s32 1, %s1447_s26  ;;  %p75_p1 = scmp.ne.s32.totalorder %s1447_s26, %s1443_s25 }
  0x11   : > { %p76_p2 = scmp.eq.s32.totalorder %s1467_s7, 0  ;;  %s1965_s10 = smov (%p33_p0, %s32_s10), 0 }
  0x12   : > { %1942 = sst [smem:[#allocation13_spill]] %s1965_s10  ;;  %s1967_s11 = smov (!%p33_p0, %s35_s11), %s1463_s30 }
  0x13   : > { %s65_s13 = ssub.s32 %s1459_s29, %s1965_s10  ;;  %p1581_p3 = por %p76_p2, %p75_p1 }
  0x14   : > { %p37_p4 = scmp.ge.s32.totalorder %s1967_s11, 2  ;;  %p66_p5 = scmp.eq.s32.totalorder %s65_s13, 0 }
  0x15   : > { %p81_p6 = scmp.ne.s32.totalorder %s1443_s25, %s1439_s24  ;;  %p82_p7 = scmp.eq.s32.totalorder %s1065_s8, 0 }
  0x16   : > { %s1969_s11 = smov (%p37_p4, %s1967_s11), 0  ;;  %s122_s19 = sadd.s32 1, %s1435_s23 }
  0x17   : > { %1944 = sst [smem:[#allocation14_spill]] %s1969_s11  ;;  %p1591_p8 = por %p82_p7, %p81_p6 }
  0x18   : > { %s1589_s15 = scalar_select %p66_p5, %s1447_s26, %s68_s12  }
  0x19   : > { %s117_s17 = ssub.s32 %s1463_s30, %s1969_s11  ;;  %p132_p10 = scmp.ne.s32.totalorder %s1435_s23, %s1431_s22 }
  0x1a   : > { %1945 = sst [smem:[#allocation15_spill]] %s1589_s15  ;;  %s119_s18 = sor.u32 %s117_s17, %s65_s13 }
  0x1b   : > { %p120_p9 = scmp.eq.s32.totalorder %s119_s18, 0  ;;  %p133_p11 = scmp.eq.s32.totalorder %s1065_s8, 3 }
  0x1c   : > { %p138_p12 = scmp.ne.s32.totalorder %s1431_s22, %s1427_s21  ;;  %p139_p0 = scmp.eq.s32.totalorder %s1066_s9, 3 }
  0x1d   : > { %s1603_s20 = scalar_select %p120_p9, %s1435_s23, %s122_s19  }
  0x1e   : > { %p1605_p13 = por %p133_p11, %p132_p10  ;;  %p1149_p1 = scmp.lt.s32.totalorder %s1467_s7, 4 }
  0x1f   : > { %1947 = sst [smem:[#allocation16_spill]] %s1603_s20  ;;  %p1610_p2 = por %p139_p0, %p138_p12 }
  0x20   : > { %s246_s11 = sand.u32 1, %s1447_s26   ;;  %s1131_s17 = sshll.u32 %s1459_s29, 8 }
  0x21   : > { %s1069_s13 = sshll.u32 %s246_s11, 8  ;;  %s1950_s1 = sld [smem:[#allocation17_spill]] }
  0x22   : > { %s250_s30 = scalar_lea.vmem [#allocation2], %s1069_s13  ;;  %p1621_p4 = pnand %p1149_p1, %p1581_p3 }
  0x23   : > { %s257_s19 = sshll.u32 %s250_s30, 4  ;;  %s247_s9 = scalar_lea.sflag [#allocation3], %s246_s11  ;;  %s258_s19 = int_to_ptr.vmem [resolvable:$true] %s257_s19 }
  0x24   : > { %p1321_p5 = pneg %p1621_p4  ;;  %s1332_s20 = scalar_lea.vmem %s258_s19, 4096 }
  0x25   : > { %p1333_p6 = scmp.ne.s32.totalorder %s258_s19, %s1332_s20  ;;  %s1469_s29 = smov [#allocation2]  }
  0x26   : > { %s1337_s26 = sshll.u32 %s1469_s29, 4  ;;  %s1338_s26 = int_to_ptr.vmem [resolvable:$false] %s1337_s26 }
  0x27   : > { %s256_s8 = scalar_lea.hbm %s1950_s1, %s1131_s17  ;;  %p1335_p7 = pnand %p1333_p6, %p1321_p5 }
  0x28   : > { %s1339_s10 = scalar_lea.vmem %s1338_s26, 8192  ;;  %p1340_p10 = scmp.lt.s32.totalorder %s258_s19, %s1338_s26 }
  0x29   : > { %p1336_p9 = pneg %p1335_p7  ;;  %p1341_p11 = scmp.lt.s32.totalorder %s1339_s10, %s1332_s20 }
  0x2b   : > { %p1342_p12 = por %p1341_p11, %p1340_p10 }
  0x2d   : > { %p1343_p0 = pnand %p1342_p12, %p1336_p9 }
  0x2f   : > { %1346 = shalt.err (!%p1343_p0)
}
  0x30   : > { %s1470_s30 = smov 512   ;;  %s1471_s11 = smov 256  }
  0x31   : > { %s1472_s14 = smov 16   ;;  %p1072_p3 = scmp.ge.s32.totalorder %s1467_s7, 1 }
  0x32   : > { %1144 = dma.hbm_to_vmem [thread:$0]  (!%p1621_p4), %s256_s8, 4096, %s258_s19, %s247_s9, %s1470_s30, %s1471_s11, %s1472_s14  }
  0x33   : > { %p274_p1 = scmp.lt.s32.totalorder %s1467_s7, 5 }
  0x35   : > { %p275_p5 = pnand %p1072_p3, %p274_p1 }
  0x36   : > { %s280_s29 = sand.u32 (!%p275_p5), 1, %s1443_s25  }
  0x37   : > { %278 = sbr.rel (%p275_p5) target bundleno = 746 (0x2ea), region = 32  ;;  %s1073_s26 = sshll.u32 (!%p275_p5), %s280_s29, 8 }
  0x38   : > { %s281_s20 = scalar_lea.sflag (!%p275_p5), [#allocation3], %s280_s29  ;;  %s1632_s13 = scalar_lea.vmem (!%p275_p5), [#allocation2], %s1073_s26 }
  0x3c   : > { %1418 = dma.done.wait (%p1591_p8), %s281_s20, 4096  }
  0x3d   : > { %1420 = vsyncadd (%p1591_p8), %s281_s20, 4294963200  ;;  %s1933_s15 = sand.u32 1, %s1431_s22   ;;  %s1075_s17 = sshll.u32 %s1455_s28, 1 }
  0x3e   : > { %s1074_s18 = sshll.u32 %s1933_s15, 5  ;;  %p339_p4 = scmp.lt.s32.totalorder %s1075_s17, 3 }
  0x3f   : > { %s1667_s9 = scalar_lea.vmem [#allocation5], %s1074_s18  ;;  %p1085_p8 = scmp.ne.s32.totalorder %s1451_s27, 0 }
  0x40   : > { %s1971_s17 = smov (!%p339_p4, %s1075_s17), 3 }
  0x41   : > { %s1076_s8 = sshll.u32 %s1971_s17, 2  ;;  %s1078_s19 = sshll.u32 %s1971_s17, 3 }
  0x42   : > { %s1645_s30 = scalar_lea.vmem %s1921_s0, %s1076_s8  ;;  %s1650_s16 = scalar_lea.vmem %s1923_s2, %s1078_s19 }
  0x43   : > { %s1655_s20 = scalar_lea.vmem %s1925_s4, %s1078_s19  ;;  %s1660_s25 = scalar_lea.vmem %s1926_s5, %s1078_s19 }
  0x44   : > { %s1665_s8 = scalar_lea.vmem %s1927_s6, %s1078_s19  ;;  %375 = sbr.rel (%p1085_p8) target bundleno = 77 (0x4d), region = 40 }
  0x49   : > { %vm376_vm0 = vcmask 7168   ;;  %v1473_v0 = vmov -inf   ;;  %v1474_v1 = vmov 0.0  }
  0x4a   : > { %377 = vst.msk [vmem:[%s1655_s20] sm:$0xff] %vm376_vm0, %v1473_v0  ;;  %379 = vst.msk [vmem:[%s1660_s25] sm:$0xff] %vm376_vm0, %v1474_v1 }
  0x4b   : > { %381 = vst.msk [vmem:[%s1665_s8] sm:$0xff] %vm376_vm0, %v1474_v1  ;;  %378 = vst.msk [vmem:[%s1655_s20 + $0x8] sm:$0xff] %vm376_vm0, %v1473_v0 }
  0x4c   : > { %380 = vst.msk [vmem:[%s1660_s25 + $0x8] sm:$0xff] %vm376_vm0, %v1474_v1  ;;  %382 = vst.msk [vmem:[%s1665_s8 + $0x8] sm:$0xff] %vm376_vm0, %v1474_v1 }
  0x4d PF: > { %v1250_v2 = vld [vmem:[%s1632_s13 + $0xe4] ss:$16 sps:$4 sm:$0xff]   ;;  %v1252_v3 = vld [vmem:[%s1632_s13 + $0xec] ss:$16 sps:$4 sm:$0xff]   ;;  %v1475_v4 = vmov 0   ;;  %v669_v36 = vlaneseq  ;;  %s1119_s1 = sshll.u32 %s1451_s27, 9 }
  0x4e   : > { %615 = vmatprep.mubr.bf16.mxu0 %v1475_v4  ;;  %658 = vmatprep.mubr.bf16.mxu1 %v1475_v4  ;;  %v1254_v5 = vld [vmem:[%s1632_s13 + $0xe0] ss:$16 sps:$4 sm:$0xff]   ;;  %v1255_v6 = vld [vmem:[%s1632_s13 + $0xe8] ss:$16 sps:$4 sm:$0xff]   ;;  %v1256_v7 = vld [vmem:[%s1632_s13 + $0xc4] ss:$16 sps:$4 sm:$0xff]  }
  0x4f   : > { %583 = vmatprep.subr.bf16.mxu0 %v1250_v2  ;;  %1249 = vset.pattern.permute.xlu0 %v1475_v4  ;;  %v1258_v8 = vld [vmem:[%s1632_s13 + $0xcc] ss:$16 sps:$4 sm:$0xff]   ;;  %v1260_v9 = vld [vmem:[%s1632_s13 + $0xc0] ss:$16 sps:$4 sm:$0xff]   ;;  %v1261_v10 = vld [vmem:[%s1632_s13 + $0xc8] ss:$16 sps:$4 sm:$0xff]  }
  0x50   : > { %626 = vmatprep.subr.bf16.mxu1 %v1252_v3  ;;  %1248 = vset.pattern.permute.xlu1 %v1475_v4  ;;  %v1262_v11 = vld [vmem:[%s1632_s13 + $0xa4] ss:$16 sps:$4 sm:$0xff]   ;;  %v1264_v12 = vld [vmem:[%s1632_s13 + $0xac] ss:$16 sps:$4 sm:$0xff]   ;;  %v1266_v13 = vld [vmem:[%s1632_s13 + $0xa0] ss:$16 sps:$4 sm:$0xff]  }
  0x51   : > { %584 = vmatpush1.bf16.msra.mxu0 %v1254_v5  ;;  %627 = vmatpush1.bf16.msra.mxu1 %v1255_v6  ;;  %v1267_v14 = vld [vmem:[%s1632_s13 + $0xa8] ss:$16 sps:$4 sm:$0xff]   ;;  %v1268_v15 = vld [vmem:[%s1632_s13 + $0x84] ss:$16 sps:$4 sm:$0xff]   ;;  %v1270_v16 = vld [vmem:[%s1632_s13 + $0x8c] ss:$16 sps:$4 sm:$0xff]   ;;  %v766_v5 = vstv %s1119_s1 }
  0x52   : > { %585 = vmatprep.subr.bf16.mxu0 %v1256_v7  ;;  %628 = vmatprep.subr.bf16.mxu1 %v1258_v8  ;;  %v1272_v17 = vld [vmem:[%s1632_s13 + $0x80] ss:$16 sps:$4 sm:$0xff]   ;;  %v1273_v18 = vld [vmem:[%s1632_s13 + $0x88] ss:$16 sps:$4 sm:$0xff]   ;;  %v1274_v19 = vld [vmem:[%s1632_s13 + $0x64] ss:$16 sps:$4 sm:$0xff]  }
  0x53   : > { %v1276_v20 = vld [vmem:[%s1632_s13 + $0x6c] ss:$16 sps:$4 sm:$0xff]   ;;  %v1278_v21 = vld [vmem:[%s1632_s13 + $0x60] ss:$16 sps:$4 sm:$0xff]   ;;  %v1279_v22 = vld [vmem:[%s1632_s13 + $0x68] ss:$16 sps:$4 sm:$0xff]  }
  0x54   : > { %v1280_v23 = vld [vmem:[%s1632_s13 + $0x44] ss:$16 sps:$4 sm:$0xff]   ;;  %v1282_v24 = vld [vmem:[%s1632_s13 + $0x4c] ss:$16 sps:$4 sm:$0xff]   ;;  %v1284_v25 = vld [vmem:[%s1632_s13 + $0x40] ss:$16 sps:$4 sm:$0xff]  }
  0x55   : > { %586 = vmatpush1.bf16.msra.mxu0 %v1260_v9  ;;  %629 = vmatpush1.bf16.msra.mxu1 %v1261_v10  ;;  %v1285_v26 = vld [vmem:[%s1632_s13 + $0x48] ss:$16 sps:$4 sm:$0xff]   ;;  %v1286_v27 = vld [vmem:[%s1632_s13 + $0x24] ss:$16 sps:$4 sm:$0xff]   ;;  %v1288_v28 = vld [vmem:[%s1632_s13 + $0x2c] ss:$16 sps:$4 sm:$0xff]  }
  0x56   : > { %587 = vmatprep.subr.bf16.mxu0 %v1262_v11  ;;  %630 = vmatprep.subr.bf16.mxu1 %v1264_v12  ;;  %v1290_v29 = vld [vmem:[%s1632_s13 + $0x20] ss:$16 sps:$4 sm:$0xff]   ;;  %v1291_v30 = vld [vmem:[%s1632_s13 + $0x28] ss:$16 sps:$4 sm:$0xff]   ;;  %v1292_v31 = vld [vmem:[%s1632_s13 + $0x4] ss:$16 sps:$4 sm:$0xff]  }
  0x57   : > { %v1294_v32 = vld [vmem:[%s1632_s13 + $0xc] ss:$16 sps:$4 sm:$0xff]   ;;  %v1296_v33 = vld [vmem:[%s1632_s13] ss:$16 sps:$4 sm:$0xff]   ;;  %v1297_v34 = vld [vmem:[%s1632_s13 + $0x8] ss:$16 sps:$4 sm:$0xff]  }
  0x58   : > { %v1298_v35 = vld [vmem:[%s1645_s30] sm:$0xff]   ;;  %v1710_v37 = vand.u32 127, %v669_v36  ;;  %s675_s23 = ssub.s32 1000, %s1119_s1  ;;  %v1786_v9 = vld [vmem:[%s1655_s20 + $0x8] sm:$0xff]  ;;  %vm759_vm5 = vcmask 7168   ;;  %s1126_s13 = sshll.u32 %s1451_s27, 2 }
  0x59   : > { %588 = vmatpush1.bf16.msra.mxu0 %v1266_v13  ;;  %631 = vmatpush1.bf16.msra.mxu1 %v1267_v14  ;;  %v676_v39 = vstv %s675_s23  ;;  %v764_v4 = vld [vmem:[%s1650_s16] sm:$0xff]  ;;  %v765_v13 = vld [vmem:[%s1650_s16 + $0x8] sm:$0xff]  ;;  %s1136_s15 = sshll.u32 %s1455_s28, 4  ;;  %s867_s14 = sshll.u32 %s1667_s9, 4  ;;  %s1839_s14 = int_to_ptr.vmem [resolvable:$true] %s867_s14 }
  0x5a   : > { %589 = vmatprep.subr.bf16.mxu0 %v1268_v15  ;;  %632 = vmatprep.subr.bf16.mxu1 %v1270_v16  ;;  %v1715_v38 = vadd.s32 256, %v1710_v37  ;;  %v1718_v40 = vadd.s32 128, %v1710_v37  ;;  %v1721_v41 = vadd.s32 384, %v1710_v37  ;;  %vm677_vm1 = vcmp.lt.s32.totalorder %v1710_v37, %v676_v39  ;;  %v1783_v7 = vld [vmem:[%s1655_s20] sm:$0xff]  ;;  %s864_s18 = sadd.s32 %s1136_s15, %s1126_s13  ;;  %s1952_s16 = sand.u32 1, %s1431_s22  }
  0x5b   : > { %v767_v6 = vsub.s32 %v764_v4, %v766_v5  ;;  %v768_v16 = vsub.s32 %v765_v13, %v766_v5  ;;  %s1128_s19 = sshll.u32 %s864_s18, 6  ;;  %s1843_s29 = scalar_lea.sflag [#allocation4], %s1952_s16 }
  0x5c   : > { %vm679_vm2 = vcmp.lt.s32.totalorder %v1715_v38, %v676_v39  ;;  %vm678_vm3 = vcmp.lt.s32.totalorder %v1718_v40, %v676_v39  ;;  %vm680_vm4 = vcmp.lt.s32.totalorder %v1721_v41, %v676_v39  ;;  %s1836_s11 = scalar_lea.hbm %s1924_s3, %s1128_s19  ;;  %s1347_s26 = scalar_lea.vmem %s1839_s14, 512 }
  0x5d   : > { %590 = vmatpush1.bf16.msra.mxu0 %v1272_v17  ;;  %633 = vmatpush1.bf16.msra.mxu1 %v1273_v18  ;;  %p1348_p6 = scmp.ne.s32.totalorder %s1839_s14, %s1347_s26  ;;  %s1476_s27 = smov [#allocation5]  }
  0x5e   : > { %591 = vmatprep.subr.bf16.mxu0 %v1274_v19  ;;  %634 = vmatprep.subr.bf16.mxu1 %v1276_v20  ;;  %s1351_s28 = sshll.u32 %s1476_s27, 4  ;;  %s1352_s28 = int_to_ptr.vmem [resolvable:$false] %s1351_s28 }
  0x5f   : > { %p1349_p7 = pnand %p1348_p6, %p1605_p13  ;;  %p1354_p10 = scmp.lt.s32.totalorder %s1839_s14, %s1352_s28 }
  0x61   : > { %592 = vmatpush1.bf16.msra.mxu0 %v1278_v21  ;;  %635 = vmatpush1.bf16.msra.mxu1 %v1279_v22  ;;  %p1350_p9 = pneg %p1349_p7 }
  0x62   : > { %593 = vmatprep.subr.bf16.mxu0 %v1280_v23  ;;  %636 = vmatprep.subr.bf16.mxu1 %v1282_v24 }
  0x65   : > { %594 = vmatpush1.bf16.msra.mxu0 %v1284_v25  ;;  %637 = vmatpush1.bf16.msra.mxu1 %v1285_v26 }
  0x66   : > { %595 = vmatprep.subr.bf16.mxu0 %v1286_v27  ;;  %638 = vmatprep.subr.bf16.mxu1 %v1288_v28 }
  0x69   : > { %596 = vmatpush1.bf16.msra.mxu0 %v1290_v29  ;;  %639 = vmatpush1.bf16.msra.mxu1 %v1291_v30 }
  0x6a   : > { %597 = vmatprep.subr.bf16.mxu0 %v1292_v31  ;;  %640 = vmatprep.subr.bf16.mxu1 %v1294_v32 }
  0x6d   : > { %598 = vmatpush1.bf16.msra.mxu0 %v1296_v33  ;;  %641 = vmatpush1.bf16.msra.mxu1 %v1297_v34 }
  0x70   : > { %616 = vmatmul.mubr.bf16.vlgmr.msra.gmra.mxu0 %v1298_v35  ;;  %659 = vmatmul.mubr.bf16.vlgmr.msra.gmra.mxu1 %v1298_v35 }
 0x130   : > { %v617_v42 = vpop.f32.mrf.mxu0  ;;  %v660_v43 = vpop.f32.mrf.mxu1 }
 0x131   : > { %v1729_v44 = vsel %vm677_vm1, %v617_v42, -inf  ;;  %v1733_v45 = vsel %vm679_vm2, %v660_v43, -inf }
 0x132   : > { %v619_v46 = vpop.f32.mrf.mxu0  ;;  %v662_v47 = vpop.f32.mrf.mxu1  ;;  %v689_v54 = vmax.f32 %v1729_v44, %v1733_v45 }
 0x133   : > { %v1737_v48 = vsel %vm678_vm3, %v619_v46, -inf  ;;  %v1741_v49 = vsel %vm680_vm4, %v662_v47, -inf }
 0x134   : > { %v1132_v50 = vpack.c.bf16 %v1737_v48, %v1729_v44  ;;  %v1133_v51 = vpack.c.bf16 %v1741_v49, %v1733_v45  ;;  %v621_v52 = vpop.f32.mrf.mxu0  ;;  %v664_v53 = vpop.f32.mrf.mxu1  ;;  %v690_v55 = vmax.f32 %v1737_v48, %v1741_v49 }
 0x135   : > { %v1753_v56 = vsel %vm677_vm1, %v621_v52, -inf  ;;  %v1757_v57 = vsel %vm679_vm2, %v664_v53, -inf }
 0x136   : > { %831 = vst [vmem:[%s1667_s9] sm:$0xff] %v1132_v50  ;;  %832 = vst [vmem:[%s1667_s9 + $0x8] sm:$0xff] %v1133_v51  ;;  %v623_v58 = vpop.f32.mrf.mxu0  ;;  %v666_v59 = vpop.f32.mrf.mxu1  ;;  %v691_v60 = vmax.f32 %v689_v54, %v690_v55  ;;  %v694_v1 = vmax.f32 %v1753_v56, %v1757_v57 }
 0x137   : > { %v1763_v61 = vsel %vm678_vm3, %v623_v58, -inf  ;;  %v1767_v62 = vsel %vm680_vm4, %v666_v59, -inf }
 0x138   : > { %v1134_v63 = vpack.c.bf16 %v1763_v61, %v1753_v56  ;;  %v1135_v0 = vpack.c.bf16 %v1767_v62, %v1757_v57  ;;  %692 = vmax.xlane.f32.xlu0 %v691_v60  ;;  %v695_v2 = vmax.f32 %v1763_v61, %v1767_v62 }
 0x13a   : > { %833 = vst [vmem:[%s1667_s9 + $0x10] sm:$0xff] %v1134_v63  ;;  %834 = vst [vmem:[%s1667_s9 + $0x18] sm:$0xff] %v1135_v0  ;;  %v696_v3 = vmax.f32 %v694_v1, %v695_v2 }
 0x13c   : > { %697 = vmax.xlane.f32.xlu0 %v696_v3 }
 0x152   : > { %772 = vperm.xlu0 %1249, %v767_v6  }
 0x1c1   : > { %v693_v8 = vpop.xlane.xlu0 %692 }
 0x1c2   : > { %v1789_v10 = vmax.f32 %v1783_v7, %v693_v8 }
 0x1c4   : > { %v703_v11 = vsub.f32 %v1783_v7, %v1789_v10  ;;  %715 = vperm.xlu1 %1248, %v1789_v10   ;;  %762 = vst.msk [vmem:[%s1655_s20] sm:$0xff] %vm759_vm5, %v1789_v10 }
 0x1c5   : > { %v698_v12 = vpop.xlane.xlu0 %697 }
 0x1c6   : > { %v1799_v14 = vmax.f32 %v1786_v9, %v698_v12 }
 0x1c8   : > { %v704_v15 = vsub.f32 %v1786_v9, %v1799_v14  ;;  %763 = vst.msk [vmem:[%s1655_s20 + $0x8] sm:$0xff] %vm759_vm5, %v1799_v14  ;;  %720 = vperm.xlu1 %1248, %v1799_v14   ;;  %s1353_s20 = scalar_lea.vmem %s1352_s28, 1024 }
 0x1c9   : > { %p1355_p11 = scmp.lt.s32.totalorder %s1353_s20, %s1347_s26 }
 0x1cb   : > { %p1356_p12 = por %p1355_p11, %p1354_p10 }
 0x1cc   : > { %775 = vperm.xlu1 %1248, %v768_v16  }
 0x1cd   : > { %v773_v17 = vpop.permute.xlu0 %772  ;;  %p1357_p0 = pnand %p1356_p12, %p1350_p9 }
 0x1ce   : > { %vm777_vm6 = vcmp.eq.s32.totalorder %v1710_v37, %v773_v17  ;;  %vm778_vm7 = vcmp.eq.s32.totalorder %v1718_v40, %v773_v17  ;;  %vm779_vm8 = vcmp.eq.s32.totalorder %v1715_v38, %v773_v17  ;;  %vm780_vm9 = vcmp.eq.s32.totalorder %v1721_v41, %v773_v17 }
 0x1cf   : > { %v785_v18 = vsel %vm777_vm6, %v1729_v44, 0.0  ;;  %v786_v19 = vsel %vm778_vm7, %v1737_v48, 0.0  ;;  %v787_v21 = vsel %vm779_vm8, %v1733_v45, 0.0  ;;  %v788_v23 = vsel %vm780_vm9, %v1741_v49, 0.0 }
 0x1d0   : > { %v793_v20 = vadd.f32 %v786_v19, %v785_v18 }
 0x1d2   : > { %v794_v22 = vadd.f32 %v793_v20, %v787_v21 }
 0x1d4   : > { %v795_v24 = vadd.f32 %v794_v22, %v788_v23 }
 0x1f0   : > { %796 = vadd.xlane.f32.xlu1 %v795_v24 }
 0x23f   : > { %v716_v25 = vpop.permute.xlu1 %715 }
 0x240   : > { %v723_v26 = vsub.f32 %v1729_v44, %v716_v25  ;;  %v724_v27 = vsub.f32 %v1737_v48, %v716_v25  ;;  %v725_v28 = vsub.f32 %v1733_v45, %v716_v25  ;;  %v726_v29 = vsub.f32 %v1741_v49, %v716_v25 }
 0x242   : > { %v731_v30 = vmul.f32 1.442695, %v723_v26  ;;  %v733_v31 = vmul.f32 1.442695, %v724_v27  ;;  %v735_v32 = vmul.f32 1.442695, %v725_v28 }
 0x243   : > { %v737_v33 = vmul.f32 1.442695, %v726_v29  ;;  %v721_v34 = vpop.permute.xlu1 %720 }
 0x244   : > { %1299 = vpow2.f32 %v731_v30  ;;  %v727_v35 = vsub.f32 %v1753_v56, %v721_v34  ;;  %v728_v36 = vsub.f32 %v1763_v61, %v721_v34  ;;  %v729_v39 = vsub.f32 %v1757_v57, %v721_v34 }
 0x245   : > { %1301 = vpow2.f32 %v733_v31  ;;  %v730_v42 = vsub.f32 %v1767_v62, %v721_v34 }
 0x246   : > { %1303 = vpow2.f32 %v735_v32  ;;  %v739_v43 = vmul.f32 1.442695, %v727_v35  ;;  %v741_v44 = vmul.f32 1.442695, %v728_v36  ;;  %v743_v45 = vmul.f32 1.442695, %v729_v39 }
 0x247   : > { %1305 = vpow2.f32 %v737_v33  ;;  %v745_v46 = vmul.f32 1.442695, %v730_v42  ;;  %v776_v47 = vpop.permute.xlu1 %775 }
 0x248   : > { %1307 = vpow2.f32 %v739_v43  ;;  %vm781_vm10 = vcmp.eq.s32.totalorder %v1710_v37, %v776_v47  ;;  %vm782_vm11 = vcmp.eq.s32.totalorder %v1718_v40, %v776_v47  ;;  %vm783_vm12 = vcmp.eq.s32.totalorder %v1715_v38, %v776_v47 }
 0x249   : > { %1309 = vpow2.f32 %v741_v44  ;;  %v789_v48 = vsel %vm781_vm10, %v1753_v56, 0.0  ;;  %v790_v49 = vsel %vm782_vm11, %v1763_v61, 0.0  ;;  %v791_v37 = vsel %vm783_vm12, %v1757_v57, 0.0 }
 0x24a   : > { %1311 = vpow2.f32 %v743_v45  ;;  %v798_v54 = vadd.f32 %v790_v49, %v789_v48  ;;  %vm784_vm13 = vcmp.eq.s32.totalorder %v1721_v41, %v776_v47 }
 0x24b   : > { %1313 = vpow2.f32 %v745_v46  ;;  %v792_v1 = vsel %vm784_vm13, %v1767_v62, 0.0 }
 0x24c   : > { %v799_v56 = vadd.f32 %v798_v54, %v791_v37 }
 0x24e   : > { %v800_v3 = vadd.f32 %v799_v56, %v792_v1 }
 0x251   : > { %v1300_v50 = vpop.eup %1299 }
 0x252   : > { %v1302_v51 = vpop.eup %1301 }
 0x253   : > { %v1304_v52 = vpop.eup %1303  ;;  %v747_v53 = vadd.f32 %v1302_v51, %v1300_v50 }
 0x254   : > { %v1306_v55 = vpop.eup %1305 }
 0x255   : > { %v1308_v58 = vpop.eup %1307  ;;  %v748_v59 = vadd.f32 %v1304_v52, %v747_v53 }
 0x256   : > { %v1310_v60 = vpop.eup %1309 }
 0x257   : > { %v749_v40 = vadd.f32 %v1306_v55, %v748_v59  ;;  %v752_v63 = vadd.f32 %v1310_v60, %v1308_v58  ;;  %v1312_v61 = vpop.eup %1311 }
 0x258   : > { %v1314_v38 = vpop.eup %1313 }
 0x259   : > { %750 = vadd.xlane.f32.xlu1 %v749_v40  ;;  %v753_v0 = vadd.f32 %v1312_v61, %v752_v63 }
 0x25b   : > { %v754_v2 = vadd.f32 %v1314_v38, %v753_v0 }
 0x25d   : > { %755 = vadd.xlane.f32.xlu0 %v754_v2  ;;  %801 = vadd.xlane.f32.xlu1 %v800_v3 }
 0x25e   : > { %1360 = shalt.err (!%p1357_p0)
}
 0x25f   : > { %s1361_s17 = scalar_lea.hbm %s1836_s11, 512  ;;  %s1365_s23 = scalar_lea.hbm %s1924_s3, 2048 }
 0x260   : > { %p1362_p3 = scmp.ne.s32.totalorder %s1836_s11, %s1361_s17  ;;  %p1366_p4 = scmp.lt.s32.totalorder %s1836_s11, %s1924_s3 }
 0x261   : > { %p1367_p8 = scmp.lt.s32.totalorder %s1365_s23, %s1361_s17 }
 0x262   : > { %p1363_p1 = pnand %p1362_p3, %p1605_p13 }
 0x263   : > { %p1368_p6 = por %p1367_p8, %p1366_p4 }
 0x264   : > { %p1364_p5 = pneg %p1363_p1 }
 0x266   : > { %p1369_p7 = pnand %p1368_p6, %p1364_p5 }
 0x268   : > { %1372 = shalt.err (!%p1369_p7)
}
 0x269   : > { %s1477_s18 = smov 256   ;;  %s1478_s19 = smov 512   ;;  %v769_v41 = vld [vmem:[%s1665_s8] sm:$0xff]  ;;  %v770_v62 = vld [vmem:[%s1665_s8 + $0x8] sm:$0xff]  ;;  %v705_v5 = vmul.f32 1.442695, %v703_v11 }
 0x26a   : > { %s1479_s10 = smov 16   ;;  %v707_v6 = vmul.f32 1.442695, %v704_v15  ;;  %v709_v12 = vld [vmem:[%s1660_s25] sm:$0xff]  ;;  %v710_v18 = vld [vmem:[%s1660_s25 + $0x8] sm:$0xff] }
 0x26b   : > { %1139 = dma.vmem_to_hbm [thread:$0]  (%p1605_p13), %s1839_s14, 512, %s1836_s11, %s1843_s29, %s1477_s18, %s1478_s19, %s1479_s10   ;;  %1315 = vpow2.f32 %v705_v5 }
 0x26c   : > { %1317 = vpow2.f32 %v707_v6 }
 0x278   : > { %v1316_v8 = vpop.eup %1315 }
 0x279   : > { %v797_v57 = vpop.xlane.xlu1 %796  ;;  %v711_v13 = vmul.f32 %v1316_v8, %v709_v12  ;;  %v1318_v16 = vpop.eup %1317 }
 0x27a   : > { %v803_v4 = vadd.f32 %v797_v57, %v769_v41  ;;  %v712_v20 = vmul.f32 %v1318_v16, %v710_v18 }
 0x27c   : > { %805 = vst.msk [vmem:[%s1665_s8] sm:$0xff] %vm759_vm5, %v803_v4 }
 0x2e2   : > { %v751_v17 = vpop.xlane.xlu1 %750 }
 0x2e3   : > { %v757_v19 = vadd.f32 %v751_v17, %v711_v13 }
 0x2e5   : > { %760 = vst.msk [vmem:[%s1660_s25] sm:$0xff] %vm759_vm5, %v757_v19 }
 0x2e6   : > { %v802_v7 = vpop.xlane.xlu1 %801  ;;  %v756_v10 = vpop.xlane.xlu0 %755 }
 0x2e7   : > { %v804_v11 = vadd.f32 %v802_v7, %v770_v62  ;;  %v758_v21 = vadd.f32 %v756_v10, %v712_v20 }
 0x2e9   : > { %806 = vst.msk [vmem:[%s1665_s8 + $0x8] sm:$0xff] %vm759_vm5, %v804_v11  ;;  %761 = vst.msk [vmem:[%s1660_s25 + $0x8] sm:$0xff] %vm759_vm5, %v758_v21 }
 0x2ea PF: > { %p1150_p13 = scmp.ge.s32.totalorder %s1467_s7, 2  ;;  %s894_s24 = sand.u32 1, %s1427_s21  }
 0x2eb   : > { %s895_s30 = scalar_lea.sflag [#allocation4], %s894_s24 }
 0x2ec   : > { %p1146_p9 = pnand %p1150_p13, %p1610_p2 }
 0x2ee   : > { %p1147_p10 = pneg %p1146_p9 }
 0x2f0   : > { %1422 = dma.done.wait (%p1147_p10), %s895_s30, 512  }
 0x2f1   : > { %1424 = vsyncadd (%p1147_p10), %s895_s30, 4294966784  ;;  %s23_s7 = sadd.s32 1, %s1467_s7   ;;  %s1953_s11 = sld [smem:[#allocation8_spill]] }
 0x2f2   : > { %p20_p11 = scmp.ge.s32.totalorder %s23_s7, 6   ;;  %s1954_s23 = sld [smem:[#allocation16_spill]] }
 0x2f3   : > { %s1955_s24 = sld [smem:[#allocation9_spill]]  ;;  %s1962_s21 = smov %s1431_s22 }
 0x2f4   : > { %s1956_s25 = sld [smem:[#allocation10_spill]] }
 0x2f5   : > { %s1957_s26 = sld [smem:[#allocation15_spill]]  ;;  %22 = sbr.rel (!%p20_p11) target bundleno = 11 (0xb), region = 123 }
 0x2f6   : > { %s1958_s27 = sld [smem:[#allocation11_spill]] }
 0x2f7   : > { %s1959_s28 = sld [smem:[#allocation12_spill]]  ;;  %s1963_s22 = smov %s1953_s11 }
 0x2f8   : > { %s1960_s29 = sld [smem:[#allocation13_spill]] }
 0x2f9   : > { %s1961_s30 = sld [smem:[#allocation14_spill]] }
 0x2fa   :  { %924 = vsyncpa [#allocation3], 1 }
 0x2fb   :  { %926 = vsyncpa [#allocation3 + $0x1], 1 }
 0x2fc   :  { %927 = vsyncpa [#allocation4], 1 }
 0x2fd   :  { %929 = vsyncpa [#allocation4 + $0x1], 1 }

</bundles_post_ra>
